<compile_context>
chip_gen: v7x
topology: tpu7x:2x2x1
jax: 0.10.0
libtpu: 0.0.40
codegen_flags: <defaults>
</compile_context>

<pallas_src>
import numpy as np
import jax
import jax.numpy as jnp
from jax.experimental import pallas as pl
from jax.experimental.pallas import tpu as pltpu


# ---------------------------------------------------------------------------
# Host-side helpers
# ---------------------------------------------------------------------------
def _interp_matrix_np(out_size, in_size):
    """Bilinear interpolation matrix (out_size, in_size), align_corners=False.

    Matches PyTorch F.interpolate(mode='bilinear', align_corners=False,
    antialias=False): src = (dst + 0.5) * in/out - 0.5, clamped at 0.
    """
    d = np.arange(out_size, dtype=np.float64)
    src = (d + 0.5) * (float(in_size) / float(out_size)) - 0.5
    src = np.maximum(src, 0.0)
    i0 = np.minimum(np.floor(src).astype(np.int64), in_size - 1)
    i1 = np.minimum(i0 + 1, in_size - 1)
    lam = (src - i0).astype(np.float32)
    rows = np.arange(out_size)
    A = np.zeros((out_size, in_size), np.float32)
    A[rows, i0] += 1.0 - lam
    A[rows, i1] += lam
    return A


def _band_plan(a_h_np, tm, in_size):
    """Per-output-row-tile input band plan for the 2-tap interpolation matrix.

    Returns (A_h_banded (base, band), starts (n_tiles,) int32, band, full_band).
    Band starts are multiples of 8 (band is chosen ≡ in_size mod 8 so the
    clamped last start stays aligned), which keeps the dynamic sublane slice
    of the (possibly uint8-packed) plane aligned.
    """
    base = a_h_np.shape[0]
    n_tiles = base // tm
    lo = np.empty(n_tiles, np.int64)
    hi = np.empty(n_tiles, np.int64)
    for t in range(n_tiles):
        cols = np.nonzero(np.any(a_h_np[t * tm:(t + 1) * tm] != 0.0, axis=0))[0]
        lo[t] = cols.min()
        hi[t] = cols.max()
    start_raw = (lo // 8) * 8
    needed = int(np.max(hi + 1 - start_raw))
    band = needed + ((in_size - needed) % 8)          # band ≡ in_size (mod 8)
    if band >= in_size:
        return a_h_np, np.zeros(n_tiles, np.int32), in_size, True
    starts = np.minimum(start_raw, in_size - band).astype(np.int32)
    a_banded = np.zeros((base, band), a_h_np.dtype)
    for t in range(n_tiles):
        s = int(starts[t])
        a_banded[t * tm:(t + 1) * tm] = a_h_np[t * tm:(t + 1) * tm, s:s + band]
    return a_banded, starts, band, False


def _pick_tile_m(base, tile_m=None):
    if tile_m is not None:
        tm = int(tile_m)
        if base % tm != 0:
            raise ValueError(f"tile_m={tm} must divide base_size={base}")
        return tm
    prefer = 256
    try:
        kind = jax.devices()[0].device_kind.lower()
        # v6e is near mem-bound here: fewer grid steps (~0.35us each) wins and
        # the extra banded-matmul FLOPs from a larger tile are hidden.
        if "v6" in kind:
            prefer = 512
    except Exception:
        pass
    for tm in (prefer, 512, 256, 128, 64, 32, 16, 8):
        if tm <= base and base % tm == 0:
            return tm
    return base


# ---------------------------------------------------------------------------
# Kernel
# ---------------------------------------------------------------------------
def _make_kernel(band, full_band, h_first):
    def kernel(scale_ref, shift_ref, starts_ref, x_ref, awt_ref, ahb_ref, o_ref):
        i = pl.program_id(0)   # plane index (batch * channel)
        t = pl.program_id(1)   # output row-tile index

        if full_band:
            xband = x_ref[0]                                  # (H, W)
        else:
            start = pl.multiple_of(starts_ref[t], 8)          # 8-aligned by construction
            xband = x_ref[0, pl.ds(start, band), :]           # (band, W)
        xband = xband.astype(jnp.bfloat16)                    # direct u8->bf16 (<=255 exact)

        if h_first:
            # (tm, band) @ (band, W) -> (tm, W), then @ (W, base) -> (tm, base)
            tmp = jnp.dot(ahb_ref[...], xband,
                          preferred_element_type=jnp.float32).astype(jnp.bfloat16)
            out = jnp.dot(tmp, awt_ref[...], preferred_element_type=jnp.float32)
        else:
            # (band, W) @ (W, base) -> (band, base), then (tm, band) @ that -> (tm, base)
            tmp = jnp.dot(xband, awt_ref[...],
                          preferred_element_type=jnp.float32).astype(jnp.bfloat16)
            out = jnp.dot(ahb_ref[...], tmp, preferred_element_type=jnp.float32)

        # Fused normalization: (x/255 - mean)/std == x * scale + shift (f32 VPU).
        o_ref[0] = (out * scale_ref[i] + shift_ref[i]).astype(o_ref.dtype)

    return kernel


# ---------------------------------------------------------------------------
# Wrapper
# ---------------------------------------------------------------------------
def end_to_end_preprocessing(x, base_size, mean=None, std=None, tile_m=None,
                             out_dtype=jnp.float32):
    """x: (B, C, H, W) uint8 or float32 in [0, 255] -> (B, C, base, base)."""
    B, C, H, W = x.shape
    base = int(base_size)

    if (mean is None) != (std is None):
        raise ValueError("mean and std must both be provided or both be None")

    tm = _pick_tile_m(base, tile_m)
    n_tiles = base // tm

    # Interpolation matrices (host-side, f32), banded A_h per output-row tile.
    a_h_np = _interp_matrix_np(base, H)              # (base, H)
    a_w_np = _interp_matrix_np(base, W)              # (base, W)
    a_hb_np, starts_np, band, full_band = _band_plan(a_h_np, tm, H)

    # Pick contraction order: W-first vs H-first (same refs, different dot
    # association).  FLOP model with banding; larger term first wins.
    cost_w_first = n_tiles * (band * W * base + tm * band * base)
    cost_h_first = n_tiles * (tm * band * W + tm * W * base)
    h_first = cost_h_first < cost_w_first

    a_hb = jnp.asarray(a_hb_np, jnp.bfloat16)        # (base, band)
    a_wt = jnp.asarray(a_w_np.T, jnp.bfloat16)       # (W, base)
    starts = jnp.asarray(starts_np, jnp.int32)       # (n_tiles,)

    if mean is not None:
        mean_a = jnp.asarray(mean, jnp.float32)
        std_a = jnp.asarray(std, jnp.float32)
        if mean_a.shape != (C,) or std_a.shape != (C,):
            raise ValueError("mean/std must have length C")
        scale_c = 1.0 / (255.0 * std_a)
        shift_c = -mean_a / std_a
    else:
        scale_c = jnp.full((C,), 1.0 / 255.0, jnp.float32)
        shift_c = jnp.zeros((C,), jnp.float32)
    scale = jnp.tile(scale_c, B)                     # (B*C,)
    shift = jnp.tile(shift_c, B)                     # (B*C,)

    x_flat = x.reshape(B * C, H, W)                  # raw planes stay in HBM; cast in-kernel

    # Right-size VMEM: double-buffered plane + A_w^T + A_h band tile + out tile.
    plane_b = H * W * x_flat.dtype.itemsize
    awt_b = W * base * 2
    ahb_b = tm * band * 2
    out_b = tm * base * np.dtype(out_dtype).itemsize
    needed = 2 * (plane_b + awt_b + ahb_b + out_b)
    vmem_limit = int(min(max(needed + (16 << 20), 32 << 20), 96 << 20))

    kernel = _make_kernel(band=band, full_band=full_band, h_first=h_first)

    out_flat = pl.pallas_call(
        kernel,
        out_shape=jax.ShapeDtypeStruct((B * C, base, base), out_dtype),
        grid=(B * C, n_tiles),
        in_specs=[
            pl.BlockSpec(memory_space=pltpu.MemorySpace.SMEM),       # scale (B*C,)
            pl.BlockSpec(memory_space=pltpu.MemorySpace.SMEM),       # shift (B*C,)
            pl.BlockSpec(memory_space=pltpu.MemorySpace.SMEM),       # band starts (n_tiles,)
            pl.BlockSpec((1, H, W), lambda i, t: (i, 0, 0)),         # raw plane, DMA'd once per plane
            pl.BlockSpec((W, base), lambda i, t: (0, 0)),            # A_w^T (resident constant)
            pl.BlockSpec((tm, band), lambda i, t: (t, 0)),           # banded A_h row tile
        ],
        out_specs=pl.BlockSpec((1, tm, base), lambda i, t: (i, t, 0)),
        compiler_params=pltpu.CompilerParams(
            dimension_semantics=("parallel", "parallel"),            # no carried state
            vmem_limit_bytes=vmem_limit,
        ),
    )(scale, shift, starts, x_flat, a_wt, a_hb)

    return out_flat.reshape(B, C, base, base)


# ---------------------------------------------------------------------------
# Test
# ---------------------------------------------------------------------------
def _reference(x, base, mean, std):
    B, C, H, W = x.shape
    a_h = jnp.asarray(_interp_matrix_np(base, H), jnp.float32)
    a_w = jnp.asarray(_interp_matrix_np(base, W), jnp.float32)
    y = jnp.einsum("oh,bchw,pw->bcop", a_h, x.astype(jnp.float32), a_w)
    y = y / 255.0
    y = (y - jnp.asarray(mean, jnp.float32).reshape(1, C, 1, 1)) \
        / jnp.asarray(std, jnp.float32).reshape(1, C, 1, 1)
    return y


if __name__ == "__main__":
    key = jax.random.PRNGKey(0)
    k1, k2 = jax.random.split(key)
    mean = [0.485, 0.456, 0.406]
    std = [0.229, 0.224, 0.225]

    # Case 1: square planes, multiple row tiles -> exercises the banded,
    # aligned dynamic-slice path with the W-first contraction order.
    B, C, H, W, BASE, TM = 2, 3, 48, 48, 256, 64
    x = jax.random.randint(k1, (B, C, H, W), 0, 256, dtype=jnp.int32).astype(jnp.uint8)
    out = jax.block_until_ready(end_to_end_preprocessing(x, BASE, mean=mean, std=std, tile_m=TM))
    assert out.shape == (B, C, BASE, BASE)
    assert out.dtype == jnp.float32
    ref = _reference(x, BASE, mean, std)
    err = float(jnp.max(jnp.abs(out - ref)))
    assert err < 0.1, f"case1 max abs error {err}"

    # Case 2: tall/narrow planes -> exercises the H-first contraction order.
    B2, C2, H2, W2, BASE2, TM2 = 1, 3, 128, 16, 256, 64
    x2 = jax.random.randint(k2, (B2, C2, H2, W2), 0, 256, dtype=jnp.int32).astype(jnp.uint8)
    out2 = jax.block_until_ready(end_to_end_preprocessing(x2, BASE2, mean=mean, std=std, tile_m=TM2))
    assert out2.shape == (B2, C2, BASE2, BASE2)
    ref2 = _reference(x2, BASE2, mean, std)
    err2 = float(jnp.max(jnp.abs(out2 - ref2)))
    assert err2 < 0.1, f"case2 max abs error {err2}"

    print("KERNEL_OK")
</pallas_src>

<mosaic_0001>
module attributes {stable_mosaic.version = 11 : i64} {
  func.func @kernel(%arg0: i32, %arg1: i32, %arg2: memref<6xf32, #tpu.memory_space<smem>>, %arg3: memref<6xf32, #tpu.memory_space<smem>>, %arg4: memref<4xi32, #tpu.memory_space<smem>>, %arg5: memref<1x48x48xi8, #tpu.memory_space<vmem>>, %arg6: memref<48x256xbf16, #tpu.memory_space<vmem>>, %arg7: memref<64x24xbf16, #tpu.memory_space<vmem>>, %arg8: memref<1x64x256xf32, #tpu.memory_space<vmem>>) attributes {dimension_semantics = [#tpu.dimension_semantics<parallel>, #tpu.dimension_semantics<parallel>], iteration_bounds = array<i64: 6, 4>, scalar_prefetch = 0 : i64, scratch_operands = 0 : i64, tpu.core_type = #tpu.core_type<tc>, window_params = [{transform_indices = @transform_0, window_bounds = array<i64: 6>}, {transform_indices = @transform_1, window_bounds = array<i64: 6>}, {transform_indices = @transform_2, window_bounds = array<i64: 4>}, {transform_indices = @transform_3, window_bounds = array<i64: 1, 48, 48>}, {pipeline_mode = #tpu.pipeline_mode<synchronous>, transform_indices = @transform_4, window_bounds = array<i64: 48, 256>}, {transform_indices = @transform_5, window_bounds = array<i64: 64, 24>}, {transform_indices = @transform_6, window_bounds = array<i64: 1, 64, 256>}]} {
    %0 = arith.index_cast %arg1 : i32 to index
    %1 = memref.load %arg4[%0] : memref<4xi32, #tpu.memory_space<smem>>
    %2 = tpu.assume_multiple %1, 8 : i32
    %c0 = arith.constant 0 : index
    %3 = arith.index_cast %2 : i32 to index
    %c0_0 = arith.constant 0 : index
    %4 = vector.load %arg5[%c0, %3, %c0_0] : memref<1x48x48xi8, #tpu.memory_space<vmem>>, vector<1x24x48xi8>
    %5 = vector.shape_cast %4 : vector<1x24x48xi8> to vector<24x48xi8>
    %6 = arith.uitofp %5 : vector<24x48xi8> to vector<24x48xbf16>
    %c0_1 = arith.constant 0 : index
    %c0_2 = arith.constant 0 : index
    %7 = vector.load %arg6[%c0_1, %c0_2] : memref<48x256xbf16, #tpu.memory_space<vmem>>, vector<48x256xbf16>
    %cst = arith.constant dense<0.000000e+00> : vector<24x256xf32>
    %8 = tpu.matmul %6, %7, %cst {dimension_numbers = #tpu.dot_dimension_numbers<[1], [0], [0], [1], [0, 0, 1, 1], [], []>} : vector<24x48xbf16>, vector<48x256xbf16>, vector<24x256xf32> -> vector<24x256xf32>
    %9 = arith.truncf %8 : vector<24x256xf32> to vector<24x256xbf16>
    %c0_3 = arith.constant 0 : index
    %c0_4 = arith.constant 0 : index
    %10 = vector.load %arg7[%c0_3, %c0_4] : memref<64x24xbf16, #tpu.memory_space<vmem>>, vector<64x24xbf16>
    %cst_5 = arith.constant dense<0.000000e+00> : vector<64x256xf32>
    %11 = tpu.matmul %10, %9, %cst_5 {dimension_numbers = #tpu.dot_dimension_numbers<[1], [0], [0], [1], [0, 0, 1, 1], [], []>} : vector<64x24xbf16>, vector<24x256xbf16>, vector<64x256xf32> -> vector<64x256xf32>
    %12 = arith.index_cast %arg0 : i32 to index
    %13 = memref.load %arg2[%12] : memref<6xf32, #tpu.memory_space<smem>>
    %14 = vector.broadcast %13 : f32 to vector<64x256xf32>
    %15 = arith.mulf %11, %14 : vector<64x256xf32>
    %16 = arith.index_cast %arg0 : i32 to index
    %17 = memref.load %arg3[%16] : memref<6xf32, #tpu.memory_space<smem>>
    %18 = vector.broadcast %17 : f32 to vector<64x256xf32>
    %19 = arith.addf %15, %18 : vector<64x256xf32>
    %c0_6 = arith.constant 0 : index
    %c0_7 = arith.constant 0 : index
    %c0_8 = arith.constant 0 : index
    %20 = vector.load %arg8[%c0_6, %c0_7, %c0_8] : memref<1x64x256xf32, #tpu.memory_space<vmem>>, vector<1x64x256xf32>
    %21 = vector.shape_cast %20 : vector<1x64x256xf32> to vector<64x256xf32>
    %22 = vector.shape_cast %19 : vector<64x256xf32> to vector<1x64x256xf32>
    tpu.vector_store %arg8[%c0_6, %c0_7, %c0_8], %22 {strides = array<i32>} : memref<1x64x256xf32, #tpu.memory_space<vmem>>, vector<1x64x256xf32>,
    return
  }
  func.func @transform_0(%arg0: i32, %arg1: i32) -> i32 {
    %c0_i32 = arith.constant 0 : i32
    %c0_i32_0 = arith.constant 0 : i32
    return %c0_i32 : i32
  }
  func.func @transform_1(%arg0: i32, %arg1: i32) -> i32 {
    %c0_i32 = arith.constant 0 : i32
    %c0_i32_0 = arith.constant 0 : i32
    return %c0_i32 : i32
  }
  func.func @transform_2(%arg0: i32, %arg1: i32) -> i32 {
    %c0_i32 = arith.constant 0 : i32
    %c0_i32_0 = arith.constant 0 : i32
    return %c0_i32 : i32
  }
  func.func @transform_3(%arg0: i32, %arg1: i32) -> (i32, i32, i32) {
    %c0_i32 = arith.constant 0 : i32
    %c0_i32_0 = arith.constant 0 : i32
    %c0_i32_1 = arith.constant 0 : i32
    return %arg0, %c0_i32, %c0_i32_0 : i32, i32, i32
  }
  func.func @transform_4(%arg0: i32, %arg1: i32) -> (i32, i32) {
    %c0_i32 = arith.constant 0 : i32
    %c0_i32_0 = arith.constant 0 : i32
    %c0_i32_1 = arith.constant 0 : i32
    return %c0_i32, %c0_i32_0 : i32, i32
  }
  func.func @transform_5(%arg0: i32, %arg1: i32) -> (i32, i32) {
    %c0_i32 = arith.constant 0 : i32
    %c0_i32_0 = arith.constant 0 : i32
    return %arg1, %c0_i32 : i32, i32
  }
  func.func @transform_6(%arg0: i32, %arg1: i32) -> (i32, i32, i32) {
    %c0_i32 = arith.constant 0 : i32
    %c0_i32_0 = arith.constant 0 : i32
    return %arg0, %arg1, %c0_i32 : i32, i32, i32
  }
}

</mosaic_0001>

<bundles_post_ra>
// kernel: tpu_custom_call.1
= control target key start
LH: loop header
LB: loop body
LE: loop exit
PB: predicated region body
PF: predicated region fallthrough
CT: control target
= control target key end

     0   :  { %s1692_s0 = inlined_call_operand.hbm [shape: f32[6], index: 0, kind: input, shape index: {}]   ;;  %s1693_s1 = inlined_call_operand.hbm [shape: f32[6], index: 1, kind: input, shape index: {}]   ;;  %s1694_s2 = inlined_call_operand.hbm [shape: s32[4], index: 2, kind: input, shape index: {}]   ;;  %s1695_s3 = inlined_call_operand.hbm [shape: u8[6,48,48], index: 3, kind: input, shape index: {}]   ;;  %s1696_s4 = inlined_call_operand.hbm [shape: bf16[48,256], index: 4, kind: input, shape index: {}]   ;;  %s1697_s5 = inlined_call_operand.vmem [shape: bf16[256,24], index: 5, kind: input, shape index: {}]   ;;  %s1698_s6 = inlined_call_operand.hbm [shape: f32[6,256,256], index: 6, kind: output, shape index: {}]  }
   0x1   :  { %1711 = sst [smem:[#allocation22_spill]] %s1692_s0 }
   0x2   :  { %1712 = sst [smem:[#allocation23_spill]] %s1693_s1 }
   0x3   :  { %1713 = sst [smem:[#allocation24_spill]] %s1694_s2 }
   0x4   :  { %1714 = sst [smem:[#allocation25_spill]] %s1696_s4 }
   0x5   :  { %1715 = sst [smem:[#allocation26_spill]] %s1698_s6 }
   0x6   :  { %11 = vsyncpa [#allocation5], 0 }
   0x7   :  { %12 = vsyncpa [#allocation7], 0 }
   0x8   :  { %13 = vsyncpa [#allocation3], 0 }
   0x9   :  { %15 = vsyncpa [#allocation3 + $0x1], 0 }
   0xa   :  { %16 = vsyncpa [#allocation11], 0 }
   0xb   :  { %17 = vsyncpa [#allocation4], 0 }
   0xc   :  { %19 = vsyncpa [#allocation4 + $0x1], 0  ;;  %s1297_s21 = smov 0   ;;  %s1299_s22 = smov 0  }
   0xd   :  { %s1301_s23 = smov 0   ;;  %s1303_s24 = smov 0  }
   0xe   :  { %s1305_s25 = smov 0   ;;  %s1307_s26 = smov 0  }
   0xf   :  { %s1309_s27 = smov 0   ;;  %s1311_s28 = smov 0  }
  0x10   :  { %s1313_s29 = smov 0   ;;  %s1315_s30 = smov 0  }
  0x11   :  { %s1317_s7 = smov 0  }
  0x12 LB: > { %1716 = sst [smem:[#allocation18_spill]] %s1207_s21  ;;  %s805_s8 = sadd.s32 4294967295, %s1247_s7   ;;  %s1247_s7 = sphi %s1317_s7, %s25_s7   ;;  %s1243_s30 = sphi %s1315_s30, %s1754_s30   ;;  %s1239_s29 = sphi %s1313_s29, %s1753_s29   ;;  %s1235_s28 = sphi %s1311_s28, %s1752_s28   ;;  %s1231_s27 = sphi %s1309_s27, %s1751_s27   ;;  %s1227_s26 = sphi %s1307_s26, %s1750_s26   ;;  %s1223_s25 = sphi %s1305_s25, %s1749_s25   ;;  %s1219_s24 = sphi %s1303_s24, %s1748_s24   ;;  %s1215_s23 = sphi %s1301_s23, %s1747_s23   ;;  %s1211_s22 = sphi %s1299_s22, %s1746_s22   ;;  %s1207_s21 = sphi %s1297_s21, %s1745_s21  }
  0x13   : > { %1717 = sst [smem:[#allocation19_spill]] %s1211_s22  ;;  %s806_s9 = sadd.s32 4294967294, %s1247_s7  }
  0x14   : > { %p120_p0 = scmp.ne.s32.totalorder %s1223_s25, %s1219_s24  ;;  %p1353_p1 = scmp.eq.s32.totalorder %s805_s8, 0 }
  0x15   : > { %p192_p2 = scmp.ne.s32.totalorder %s1215_s23, %s1211_s22  ;;  %p193_p3 = scmp.eq.s32.totalorder %s805_s8, 23 }
  0x16   : > { %s1718_s10 = scalar_select %p1353_p1, 1, 0 }
  0x17   : > { %p1361_p4 = por %p1353_p1, %p120_p0  ;;  %p198_p5 = scmp.ne.s32.totalorder %s1211_s22, %s1207_s21 }
  0x18   : > { %p1367_p6 = por %p193_p3, %p192_p2  ;;  %p199_p7 = scmp.eq.s32.totalorder %s806_s9, 23 }
  0x19   : > { %s1719_s11 = scalar_select %p1361_p4, 1, 0 }
  0x1a   : > { %s1720_s12 = scalar_select %p1367_p6, 1, 0 }
  0x1b   : > { %p807_p8 = scmp.ge.s32.totalorder %s1247_s7, 1  ;;  %p206_p9 = scmp.lt.s32.totalorder %s1247_s7, 25 }
  0x1c   : > { %1721 = sst [smem:[#allocation20_spill]] %s1720_s12  ;;  %p1373_p10 = por %p199_p7, %p198_p5 }
  0x1d   : > { %p1377_p11 = pnand %p807_p8, %p206_p9  ;;  %s1249_s16 = smov [#allocation10]  }
  0x1e   : > { %s1722_s13 = scalar_select %p1373_p10, 1, 0 }
  0x1f   : > { %s1724_s14 = scalar_select %p1377_p11, 1, 0 }
  0x20   : > { %1723 = sst [smem:[#allocation21_spill]] %s1722_s13  ;;  %p873_p12 = pneg %p1377_p11 }
  0x21   : > { %s1389_s17 = sshll.u32 %s1249_s16, 4  ;;  %s1726_s1 = sld [smem:[#allocation23_spill]]  ;;  %s246_s17 = int_to_ptr.vmem [resolvable:$true] %s1389_s17 }
  0x22   : > { %p1385_p13 = pnand %p873_p12, %p1353_p1 }
  0x24   : > { %p1399_p2 = pneg %p1385_p13 }
  0x27   : > { %s1016_s20 = scalar_lea.hbm %s1726_s1, 16 }
  0x28   : > { %p1017_p0 = scmp.ne.s32.totalorder %s1726_s1, %s1016_s20  ;;  %p1023_p7 = scmp.lt.u32.totalorder %s1016_s20, %s1726_s1 }
  0x2a   : > { %p1019_p3 = pnand %p1399_p2, %p1017_p0 }
  0x2c   : > { %p1020_p5 = pneg %p1019_p3 }
  0x2e   : > { %p1025_p8 = pnand %p1023_p7, %p1020_p5 }
  0x30   : > { %1028 = shalt.err (!%p1025_p8)
}
  0x31   : > { %s1250_s18 = smov [#allocation6]   ;;  %s1728_s0 = sld [smem:[#allocation22_spill]] }
  0x32   : > { %879 = dma.hbm_to_smem (!%p1385_p13), %s1726_s1, 16, %s1250_s18, [#allocation7]  }
  0x37   : > { %s1029_s6 = scalar_lea.hbm %s1728_s0, 16 }
  0x38   : > { %p1030_p9 = scmp.ne.s32.totalorder %s1728_s0, %s1029_s6  ;;  %p1036_p3 = scmp.lt.u32.totalorder %s1029_s6, %s1728_s0 }
  0x3a   : > { %p1032_p12 = pnand %p1030_p9, %p1399_p2 }
  0x3c   : > { %p1033_p0 = pneg %p1032_p12 }
  0x3e   : > { %p1038_p5 = pnand %p1036_p3, %p1033_p0 }
  0x40   : > { %1041 = shalt.err (!%p1038_p5)
}
  0x41   : > { %s1251_s16 = smov [#allocation2]   ;;  %s1729_s2 = sld [smem:[#allocation24_spill]] }
  0x42   : > { %876 = dma.hbm_to_smem (!%p1385_p13), %s1728_s0, 16, %s1251_s16, [#allocation5]  }
  0x47   : > { %s1042_s12 = scalar_lea.hbm %s1729_s2, 16 }
  0x48   : > { %p1043_p7 = scmp.ne.s32.totalorder %s1729_s2, %s1042_s12  ;;  %p1049_p12 = scmp.lt.u32.totalorder %s1042_s12, %s1729_s2 }
  0x4a   : > { %p1045_p8 = pnand %p1043_p7, %p1399_p2 }
  0x4c   : > { %p1046_p9 = pneg %p1045_p8 }
  0x4e   : > { %p1051_p0 = pnand %p1049_p12, %p1046_p9 }
  0x50   : > { %1054 = shalt.err (!%p1051_p0)
}
  0x51   : > { %s1252_s20 = smov [#allocation8]   ;;  %s1730_s4 = sld [smem:[#allocation25_spill]] }
  0x52   : > { %882 = dma.hbm_to_smem (!%p1385_p13), %s1729_s2, 16, %s1252_s20, [#allocation7]  }
  0x57   : > { %s1055_s22 = scalar_lea.hbm %s1730_s4, 768 }
  0x58   : > { %p1056_p3 = scmp.ne.s32.totalorder %s1730_s4, %s1055_s22  ;;  %p1062_p8 = scmp.lt.u32.totalorder %s1055_s22, %s1730_s4 }
  0x5a   : > { %p1058_p5 = pnand %p1056_p3, %p1399_p2 }
  0x5c   : > { %p1059_p7 = pneg %p1058_p5 }
  0x5e   : > { %p1064_p9 = pnand %p1062_p8, %p1059_p7 }
  0x60   : > { %1067 = shalt.err (!%p1064_p9)
}
  0x61   : > { %s1068_s13 = scalar_lea.vmem %s246_s17, 768  ;;  %p1076_p6 = scmp.lt.s32.totalorder %s246_s17, %s246_s17 }
  0x62   : > { %p1069_p12 = scmp.ne.s32.totalorder %s246_s17, %s1068_s13  ;;  %p1077_p4 = scmp.lt.s32.totalorder %s1068_s13, %s1068_s13 }
  0x64   : > { %p1071_p0 = pnand %p1069_p12, %p1399_p2  ;;  %p1078_p1 = por %p1077_p4, %p1076_p6 }
  0x66   : > { %p1072_p10 = pneg %p1071_p0 }
  0x68   : > { %p1079_p11 = pnand %p1078_p1, %p1072_p10 }
  0x6a   : > { %1082 = shalt.err (!%p1079_p11)
}
  0x6b   : > { %s1253_s20 = smov 128   ;;  %s1254_s9 = smov 8  }
  0x6c   : > { %885 = dma.hbm_to_vmem [thread:$0]  (!%p1385_p13), %s1730_s4, 768, %s246_s17, [#allocation11], %s1253_s20, %s1253_s20, %s1254_s9  }
  0x6d   : > { %s34_s19 = sadd.s32 1, %s1239_s29  ;;  %s37_s21 = sadd.s32 1, %s1243_s30 }
  0x6e   : > { %p35_p1 = scmp.ge.s32.totalorder %s34_s19, 4  ;;  %s107_s22 = sadd.s32 1, %s1227_s26 }
  0x6f   : > { %p114_p4 = scmp.ne.s32.totalorder %s1227_s26, %s1223_s25  ;;  %p115_p6 = scmp.eq.s32.totalorder %s1247_s7, 0 }
  0x70   : > { %s1756_s19 = smov (%p35_p1, %s34_s19), 0  ;;  %s1758_s21 = smov (!%p35_p1, %s37_s21), %s1243_s30 }
  0x71   : > { %s178_s15 = ssub.s32 %s1239_s29, %s1756_s19  ;;  %p39_p10 = scmp.ge.s32.totalorder %s1758_s21, 6 }
  0x72   : > { %s182_s24 = sadd.s32 1, %s1215_s23  ;;  %p1476_p11 = por %p115_p6, %p114_p4 }
  0x73   : > { %p898_p13 = scmp.lt.s32.totalorder %s1247_s7, 24  ;;  %s1760_s21 = smov (%p39_p10, %s1758_s21), 0 }
  0x74   : > { %s259_s8 = sand.u32 1, %s1227_s26   ;;  %s851_s12 = smul.u32 192, %s1243_s30 }
  0x75   : > { %s104_s6 = ssub.s32 %s1243_s30, %s1760_s21  ;;  %s850_s20 = smul.u32 12, %s259_s8 }
  0x76   : > { %p105_p2 = scmp.eq.s32.totalorder %s104_s6, 0  ;;  %s179_s13 = sor.u32 %s178_s15, %s104_s6 }
  0x77   : > { %p180_p3 = scmp.eq.s32.totalorder %s179_s13, 0  ;;  %s1496_s1 = scalar_lea.hbm %s1695_s3, %s851_s12 }
  0x78   : > { %s1488_s9 = scalar_select %p105_p2, %s1227_s26, %s107_s22  }
  0x79   : > { %s1491_s16 = scalar_select %p180_p3, %s1215_s23, %s182_s24  }
  0x7a   : > { %s263_s2 = scalar_lea.vmem [#allocation9], %s850_s20  ;;  %p1502_p5 = pnand %p898_p13, %p1476_p11 }
  0x7b   : > { %s270_s4 = sshll.u32 %s263_s2, 4  ;;  %s1508_s22 = scalar_lea.sflag [#allocation3], %s259_s8  ;;  %s1506_s4 = int_to_ptr.vmem [resolvable:$true] %s270_s4 }
  0x7c   : > { %s1083_s0 = scalar_lea.hbm %s1496_s1, 192  ;;  %p1085_p8 = pneg %p1502_p5 }
  0x7d   : > { %p1084_p7 = scmp.ne.s32.totalorder %s1496_s1, %s1083_s0  ;;  %s1088_s17 = scalar_lea.hbm %s1695_s3, 1152 }
  0x7e   : > { %p1089_p0 = scmp.lt.u32.totalorder %s1496_s1, %s1695_s3  ;;  %p1090_p1 = scmp.lt.u32.totalorder %s1088_s17, %s1083_s0 }
  0x7f   : > { %p1086_p9 = pnand %p1085_p8, %p1084_p7  ;;  %p1092_p6 = scmp.lt.u32.totalorder %s1083_s0, %s1496_s1 }
  0x80   : > { %p1091_p4 = por %p1090_p1, %p1089_p0 }
  0x81   : > { %p1087_p12 = pneg %p1086_p9 }
  0x82   : > { %p1093_p10 = por %p1092_p6, %p1091_p4 }
  0x84   : > { %p1094_p11 = pnand %p1093_p10, %p1087_p12 }
  0x86   : > { %1097 = shalt.err (!%p1094_p11)
}
  0x87   : > { %s1098_s8 = scalar_lea.vmem %s1506_s4, 192  ;;  %s1255_s13 = smov [#allocation9]  }
  0x88   : > { %p1099_p13 = scmp.ne.s32.totalorder %s1506_s4, %s1098_s8  ;;  %s1103_s20 = sshll.u32 %s1255_s13, 4  ;;  %s1104_s20 = int_to_ptr.vmem [resolvable:$false] %s1103_s20 }
  0x89   : > { %s1105_s18 = scalar_lea.vmem %s1104_s20, 384  ;;  %p1106_p7 = scmp.lt.s32.totalorder %s1506_s4, %s1104_s20 }
  0x8a   : > { %p1101_p2 = pnand %p1099_p13, %p1085_p8  ;;  %p1107_p9 = scmp.lt.s32.totalorder %s1105_s18, %s1098_s8 }
  0x8c   : > { %p1102_p3 = pneg %p1101_p2  ;;  %p1108_p0 = por %p1107_p9, %p1106_p7 }
  0x8e   : > { %p1109_p1 = pnand %p1108_p0, %p1102_p3 }
  0x90   : > { %1112 = shalt.err (!%p1109_p1)
}
  0x91   : > { %s1256_s0 = smov 32   ;;  %s1257_s2 = smov 2  }
  0x92   : > { %889 = dma.hbm_to_vmem [thread:$0]  (!%p1502_p5), %s1496_s1, 192, %s1506_s4, %s1508_s22, %s1256_s0, %s1256_s0, %s1257_s2  }
  0x93   : > { %p1733_p8 = scmp.ne.s32.totalorder %s1724_s14, 0 }
  0x94   : > { %p1734_p12 = scmp.ne.s32.totalorder (!%p1733_p8), %s1718_s10, 0 }
  0x95   : > { %291 = sbr.rel (%p1733_p8) target bundleno = 667 (0x29b), region = 44 }
  0x9c   : > { %1186 = dma.done.wait (%p1734_p12), [#allocation5], 16  }
  0x9d   : > { %1188 = vsyncadd (%p1734_p12), [#allocation5], 4294967280 }
  0x9e   : > { %1190 = dma.done.wait (%p1734_p12), [#allocation7], 32  }
  0x9f   : > { %1192 = vsyncadd (%p1734_p12), [#allocation7], 4294967264  ;;  %s305_s24 = sand.u32 1, %s1223_s25   ;;  %p1735_p5 = scmp.ne.s32.totalorder %s1719_s11, 0 }
  0xa0   : > { %s852_s15 = smul.u32 12, %s305_s24  ;;  %s306_s1 = scalar_lea.sflag [#allocation3], %s305_s24 }
  0xa2   : > { %s309_s4 = scalar_lea.vmem [#allocation9], %s852_s15 }
  0xa3   : > { %1194 = dma.done.wait (%p1735_p5), %s306_s1, 192  }
  0xa4   : > { %1196 = vsyncadd (%p1735_p5), %s306_s1, 4294967104 }
  0xa5   : > { %1198 = dma.done.wait (%p1734_p12), [#allocation11], 768  }
  0xa6   : > { %1200 = vsyncadd (%p1734_p12), [#allocation11], 4294966528 }
  0xa7   : > { %318 = sfence }
  0xa8   : > { %v1003_v0 = vld [vmem:[#allocation10 + $0x4] ss:$8 sps:$4 sm:$0xff]   ;;  %s356_s14 = sld [smem:[#allocation8 + %s1231_s27]]  ;;  %v1005_v1 = vld [vmem:[#allocation10] ss:$8 sps:$4 sm:$0xff]   ;;  %v1258_v2 = vmov 0  }
  0xa9   : > { %450 = vmatprep.mubr.bf16.mxu0 %v1258_v2  ;;  %553 = vmatprep.mubr.bf16.mxu1 %v1258_v2  ;;  %v1006_v3 = vld [vmem:[#allocation10 + $0x14] ss:$8 sps:$4 sm:$0xff]   ;;  %v1008_v4 = vld [vmem:[#allocation10 + $0x10] ss:$8 sps:$4 sm:$0xff]   ;;  %v1009_v5 = vld [vmem:[#allocation10 + $0x24] ss:$8 sps:$4 sm:$0xff]  }
  0xaa   : > { %418 = vmatprep.subr.bf16.mxu0 %v1003_v0  ;;  %v1011_v6 = vld [vmem:[#allocation10 + $0x20] ss:$8 sps:$4 sm:$0xff]   ;;  %vm411_vm0 = vcmask 392192   ;;  %s820_s17 = sshll.u32 %s1231_s27, 3  ;;  %vm514_vm1 = vcmask 1043456   ;;  %s1736_s20 = sld [smem:[#allocation19_spill]] }
  0xab   : > { %419 = vmatpush1.bf16.msra.mxu0 %v1005_v1  ;;  %p349_p4 = scmp.lt.s32.totalorder %s820_s17, 31  ;;  %vm501_vm2 = vcmask 195584   ;;  %s594_s18 = sld [smem:[#allocation2 + %s1235_s28]] }
  0xac   : > { %420 = vmatprep.subr.bf16.mxu0 %v1006_v3  ;;  %s612_s0 = sld [smem:[#allocation6 + %s1235_s28]]  ;;  %s849_s1 = sshll.u32 %s1231_s27, 4 }
  0xad   : > { %s1762_s17 = smov (!%p349_p4, %s820_s17), 31 }
  0xae   : > { %s357_s11 = sshra.s32 %s356_s14, 3  ;;  %s821_s12 = sshll.u32 %s1762_s17, 2 }
  0xaf   : > { %421 = vmatpush1.bf16.msra.mxu0 %v1008_v4  ;;  %s822_s22 = sshll.u32 %s357_s11, 1  ;;  %s352_s13 = scalar_lea.vmem %s1697_s5, %s821_s12 }
  0xb0   : > { %422 = vmatprep.subr.bf16.mxu0 %v1009_v5  ;;  %s360_s10 = scalar_lea.vmem %s309_s4, %s822_s22 [#allocation9]  ;;  %v1012_v28 = vld [vmem:[%s352_s13] sm:$0xff]   ;;  %v1013_v29 = vld [vmem:[%s352_s13 + $0x8] sm:$0xff]   ;;  %v1014_v30 = vld [vmem:[%s352_s13 + $0x10] sm:$0xff]   ;;  %s345_s2 = sand.u32 1, %s1736_s20  }
  0xb1   : > { %v361_v7 = vld [vmem:[%s360_s10] sm:$0x3]  ;;  %v362_v8 = vld [vmem:[%s360_s10 + $0x2] sm:$0x3]  ;;  %v363_v11 = vld [vmem:[%s360_s10 + $0x4] sm:$0x3]  ;;  %v1563_v32 = vstv %s594_s18 }
  0xb2   : > { %v364_v9 = vunpack.c.l.u8.bf16 %v361_v7  ;;  %v365_v10 = vunpack.c.l.u8.bf16 %v362_v8  ;;  %v366_v13 = vunpack.c.l.u8.bf16 %v363_v11  ;;  %v1015_v31 = vld [vmem:[%s352_s13 + $0x18] sm:$0xff]   ;;  %s819_s24 = sshll.u32 %s345_s2, 7  ;;  %v1567_v34 = vstv %s612_s0  ;;  %s845_s4 = sshll.u32 %s1235_s28, 6 }
  0xb3   : > { %423 = vmatpush1.bf16.msra.mxu0 %v1011_v6  ;;  %s1575_s15 = scalar_lea.vmem [#allocation12], %s819_s24  ;;  %s660_s14 = sadd.s32 %s849_s1, %s845_s4 }
  0xb4   : > { %v823_v12 = vcombine.low %v364_v9, %v365_v10  ;;  %v824_v14 = vcombine.low %v366_v13, %v366_v13  ;;  %s846_s27 = sshll.u32 %s660_s14, 7  ;;  %s663_s28 = sshll.u32 %s1575_s15, 4  ;;  %s1623_s28 = int_to_ptr.vmem [resolvable:$true] %s663_s28 }
  0xb5   : > { %s1737_s11 = sld [smem:[#allocation20_spill]]  ;;  %s1738_s17 = sld [smem:[#allocation26_spill]] }
  0xb6   : > { %831 = vmatmul.mubr.msk.bf16.vlgmr.msra.gmra.mrb[0].mxu0 %vm411_vm0, %v823_v12  ;;  %s1631_s6 = scalar_lea.sflag [#allocation4], %s345_s2  ;;  %s1113_s8 = scalar_lea.vmem %s1623_s28, 2048 }
  0xb7   : > { %460 = vmatprep.mubr.bf16.mxu0 %v1258_v2  ;;  %p1114_p6 = scmp.ne.s32.totalorder %s1623_s28, %s1113_s8  ;;  %s1259_s13 = smov [#allocation12]  }
  0xb8   : > { %s1117_s18 = sshll.u32 %s1259_s13, 4  ;;  %s1118_s18 = int_to_ptr.vmem [resolvable:$false] %s1117_s18 }
  0xb9   : > { %s1119_s0 = scalar_lea.vmem %s1118_s18, 4096  ;;  %p1120_p2 = scmp.lt.s32.totalorder %s1623_s28, %s1118_s18 }
  0xba   : > { %p1121_p3 = scmp.lt.s32.totalorder %s1119_s0, %s1113_s8 }
  0xbb   : > { %s1621_s12 = scalar_lea.hbm %s1738_s17, %s846_s27  ;;  %p1739_p10 = scmp.ne.s32.totalorder %s1737_s11, 0 }
  0xbc   : > { %p1122_p7 = por %p1121_p3, %p1120_p2 }
  0xbd   : > { %p1115_p11 = pnand %p1114_p6, %p1739_p10 }
  0xbe   : > { %832 = vmatmul.mubr.msk.bf16.gmra.mrb[4].mxu0 %vm411_vm0, %v824_v14 }
  0xbf   : > { %p1116_p13 = pneg %p1115_p11 }
  0xc1   : > { %p1123_p9 = pnand %p1122_p7, %p1116_p13 }
 0x189   : > { %v452_v15 = vpop.f32.mrb[0].mxu0 }
 0x18a   : > { %v454_v16 = vpop.f32.mrb[1].mxu0 }
 0x18b   : > { %v456_v17 = vpop.f32.mrb[2].mxu0 }
 0x18c   : > { %v469_v18 = vpack.c.bf16 %v456_v17, %v452_v15  ;;  %v458_v19 = vpop.f32.mrb[3].mxu0 }
 0x18d   : > { %v470_v20 = vpack.c.bf16 %v458_v19, %v454_v16 }
 0x18f   : > { %521 = vmatprep.subr.bf16.mxu1 %v470_v20 }
 0x190   : > { %522 = vmatpush1.bf16.msra.mxu1 %v469_v18 }
 0x191   : > { %v462_v21 = vpop.f32.mrb[4].mxu0 }
 0x192   : > { %v471_v22 = vpack.c.bf16 %v462_v21, %v462_v21  ;;  %v464_v23 = vpop.f32.mrb[5].mxu0 }
 0x193   : > { %v472_v24 = vpack.c.bf16 %v464_v23, %v464_v23  ;;  %v466_v25 = vpop.f32.mrb[6].mxu0 }
 0x194   : > { %v467_v26 = vpop.f32.mrb[7].mxu0  ;;  %v516_v27 = vsel %vm514_vm1, %v471_v22, 0 }
 0x195   : > { %837 = vmatprep.subr.msk.bf16.mxu1 %vm514_vm1, %v472_v24 }
 0x196   : > { %524 = vmatpush1.bf16.msra.mxu1 %v516_v27 }
 0x199   : > { %838 = vmatmul.mubr.msk.bf16.vlgmr.msra.gmra.mrb[0].mxu1 %vm501_vm2, %v1012_v28 }
 0x19a   : > { %563 = vmatprep.mubr.bf16.mxu1 %v1258_v2 }
 0x1a1   : > { %839 = vmatmul.mubr.msk.bf16.gmra.mrb[4].mxu1 %vm501_vm2, %v1013_v29 }
 0x1a2   : > { %573 = vmatprep.mubr.bf16.mxu1 %v1258_v2 }
 0x1a9   : > { %840 = vmatmul.mubr.msk.bf16.gmra.mrb[8].mxu1 %vm501_vm2, %v1014_v30 }
 0x1aa   : > { %583 = vmatprep.mubr.bf16.mxu1 %v1258_v2 }
 0x1b1   : > { %841 = vmatmul.mubr.msk.bf16.gmra.mrb[12].mxu1 %vm501_vm2, %v1015_v31 }
 0x26c   : > { %v555_v33 = vpop.f32.mrb[0].mxu1 }
 0x26d   : > { %v596_v35 = vmul.f32 %v1563_v32, %v555_v33  ;;  %v557_v36 = vpop.f32.mrb[1].mxu1 }
 0x26e   : > { %v597_v37 = vmul.f32 %v1563_v32, %v557_v36  ;;  %v559_v38 = vpop.f32.mrb[2].mxu1 }
 0x26f   : > { %v614_v39 = vadd.f32 %v1567_v34, %v596_v35  ;;  %v598_v40 = vmul.f32 %v1563_v32, %v559_v38  ;;  %v561_v41 = vpop.f32.mrb[3].mxu1 }
 0x270   : > { %v615_v42 = vadd.f32 %v1567_v34, %v597_v37  ;;  %v599_v43 = vmul.f32 %v1563_v32, %v561_v41 }
 0x271   : > { %630 = vst [vmem:[%s1575_s15] sm:$0xff] %v614_v39  ;;  %v616_v44 = vadd.f32 %v1567_v34, %v598_v40 }
 0x272   : > { %631 = vst [vmem:[%s1575_s15 + $0x8] sm:$0xff] %v615_v42  ;;  %v617_v45 = vadd.f32 %v1567_v34, %v599_v43 }
 0x273   : > { %632 = vst [vmem:[%s1575_s15 + $0x10] sm:$0xff] %v616_v44 }
 0x274   : > { %633 = vst [vmem:[%s1575_s15 + $0x18] sm:$0xff] %v617_v45  ;;  %v565_v46 = vpop.f32.mrb[4].mxu1 }
 0x275   : > { %v600_v47 = vmul.f32 %v1563_v32, %v565_v46  ;;  %v567_v48 = vpop.f32.mrb[5].mxu1 }
 0x276   : > { %v601_v49 = vmul.f32 %v1563_v32, %v567_v48  ;;  %v569_v50 = vpop.f32.mrb[6].mxu1 }
 0x277   : > { %v618_v51 = vadd.f32 %v1567_v34, %v600_v47  ;;  %v602_v52 = vmul.f32 %v1563_v32, %v569_v50  ;;  %v571_v53 = vpop.f32.mrb[7].mxu1 }
 0x278   : > { %v619_v54 = vadd.f32 %v1567_v34, %v601_v49  ;;  %v603_v55 = vmul.f32 %v1563_v32, %v571_v53 }
 0x279   : > { %634 = vst [vmem:[%s1575_s15 + $0x20] sm:$0xff] %v618_v51  ;;  %v620_v56 = vadd.f32 %v1567_v34, %v602_v52 }
 0x27a   : > { %635 = vst [vmem:[%s1575_s15 + $0x28] sm:$0xff] %v619_v54  ;;  %v621_v57 = vadd.f32 %v1567_v34, %v603_v55 }
 0x27b   : > { %636 = vst [vmem:[%s1575_s15 + $0x30] sm:$0xff] %v620_v56 }
 0x27c   : > { %637 = vst [vmem:[%s1575_s15 + $0x38] sm:$0xff] %v621_v57  ;;  %v575_v58 = vpop.f32.mrb[8].mxu1 }
 0x27d   : > { %v604_v59 = vmul.f32 %v1563_v32, %v575_v58  ;;  %v577_v60 = vpop.f32.mrb[9].mxu1 }
 0x27e   : > { %v605_v61 = vmul.f32 %v1563_v32, %v577_v60  ;;  %v579_v62 = vpop.f32.mrb[10].mxu1 }
 0x27f   : > { %v622_v63 = vadd.f32 %v1567_v34, %v604_v59  ;;  %v606_v0 = vmul.f32 %v1563_v32, %v579_v62  ;;  %v581_v1 = vpop.f32.mrb[11].mxu1 }
 0x280   : > { %v623_v2 = vadd.f32 %v1567_v34, %v605_v61  ;;  %v607_v3 = vmul.f32 %v1563_v32, %v581_v1 }
 0x281   : > { %638 = vst [vmem:[%s1575_s15 + $0x40] sm:$0xff] %v622_v63  ;;  %v624_v4 = vadd.f32 %v1567_v34, %v606_v0 }
 0x282   : > { %639 = vst [vmem:[%s1575_s15 + $0x48] sm:$0xff] %v623_v2  ;;  %v625_v5 = vadd.f32 %v1567_v34, %v607_v3 }
 0x283   : > { %640 = vst [vmem:[%s1575_s15 + $0x50] sm:$0xff] %v624_v4 }
 0x284   : > { %641 = vst [vmem:[%s1575_s15 + $0x58] sm:$0xff] %v625_v5  ;;  %v585_v6 = vpop.f32.mrb[12].mxu1 }
 0x285   : > { %v608_v7 = vmul.f32 %v1563_v32, %v585_v6  ;;  %v587_v8 = vpop.f32.mrb[13].mxu1 }
 0x286   : > { %v609_v9 = vmul.f32 %v1563_v32, %v587_v8  ;;  %v589_v10 = vpop.f32.mrb[14].mxu1 }
 0x287   : > { %v626_v11 = vadd.f32 %v1567_v34, %v608_v7  ;;  %v610_v12 = vmul.f32 %v1563_v32, %v589_v10  ;;  %v591_v13 = vpop.f32.mrb[15].mxu1 }
 0x288   : > { %v627_v14 = vadd.f32 %v1567_v34, %v609_v9  ;;  %v611_v15 = vmul.f32 %v1563_v32, %v591_v13 }
 0x289   : > { %642 = vst [vmem:[%s1575_s15 + $0x60] sm:$0xff] %v626_v11  ;;  %v628_v16 = vadd.f32 %v1567_v34, %v610_v12 }
 0x28a   : > { %643 = vst [vmem:[%s1575_s15 + $0x68] sm:$0xff] %v627_v14  ;;  %v629_v17 = vadd.f32 %v1567_v34, %v611_v15 }
 0x28b   : > { %644 = vst [vmem:[%s1575_s15 + $0x70] sm:$0xff] %v628_v16 }
 0x28c   : > { %645 = vst [vmem:[%s1575_s15 + $0x78] sm:$0xff] %v629_v17 }
 0x28d   : > { %1126 = shalt.err (!%p1123_p9)
}
 0x28e   : > { %s1127_s20 = scalar_lea.hbm %s1621_s12, 2048  ;;  %s1131_s15 = scalar_lea.hbm %s1738_s17, 49152 }
 0x28f   : > { %p1128_p0 = scmp.ne.s32.totalorder %s1621_s12, %s1127_s20  ;;  %p1132_p12 = scmp.lt.u32.totalorder %s1621_s12, %s1738_s17 }
 0x290   : > { %p1133_p5 = scmp.lt.u32.totalorder %s1131_s15, %s1127_s20  ;;  %p1135_p6 = scmp.lt.u32.totalorder %s1127_s20, %s1621_s12 }
 0x291   : > { %p1129_p1 = pnand %p1128_p0, %p1739_p10 }
 0x292   : > { %p1134_p4 = por %p1133_p5, %p1132_p12 }
 0x293   : > { %p1130_p8 = pneg %p1129_p1 }
 0x294   : > { %p1136_p11 = por %p1135_p6, %p1134_p4 }
 0x296   : > { %p1137_p13 = pnand %p1136_p11, %p1130_p8 }
 0x298   : > { %1140 = shalt.err (!%p1137_p13)
}
 0x299   : > { %s1260_s14 = smov 256   ;;  %s1261_s27 = smov 16  }
 0x29a   : > { %871 = dma.vmem_to_hbm [thread:$0]  (%p1739_p10), %s1623_s28, 2048, %s1621_s12, %s1631_s6, %s1260_s14, %s1260_s14, %s1261_s27  }
 0x29b PF: > { %s1740_s22 = sld [smem:[#allocation18_spill]]  ;;  %s1741_s10 = sld [smem:[#allocation21_spill]] }
 0x29c   : > { %p903_p2 = scmp.ge.s32.totalorder %s1247_s7, 2 }
 0x2a1   : > { %s678_s8 = sand.u32 1, %s1740_s22   ;;  %p1742_p3 = scmp.ne.s32.totalorder %s1741_s10, 0 }
 0x2a2   : > { %s679_s13 = scalar_lea.sflag [#allocation4], %s678_s8 }
 0x2a3   : > { %p891_p7 = pnand %p903_p2, %p1742_p3 }
 0x2a5   : > { %1202 = dma.done.wait (!%p891_p7), %s679_s13, 2048  }
 0x2a6   : > { %1204 = vsyncadd (!%p891_p7), %s679_s13, 4294965248  ;;  %s25_s7 = sadd.s32 1, %s1247_s7   ;;  %s1743_s18 = sld [smem:[#allocation19_spill]] }
 0x2a7   : > { %p22_p9 = scmp.ge.s32.totalorder %s25_s7, 26   ;;  %s1744_s11 = smov %s1760_s21 }
 0x2a8   : > { %s1746_s22 = smov %s1215_s23  ;;  %s1747_s23 = smov %s1491_s16 }
 0x2a9   : > { %s1748_s24 = smov %s1223_s25  ;;  %s1749_s25 = smov %s1227_s26 }
 0x2aa   : > { %s1750_s26 = smov %s1488_s9  ;;  %s1751_s27 = smov %s1239_s29 }
 0x2ab   : > { %s1752_s28 = smov %s1243_s30  ;;  %s1753_s29 = smov %s1756_s19 }
 0x2ac   : > { %s1745_s21 = smov %s1743_s18  ;;  %s1754_s30 = smov %s1744_s11 }
 0x2ad   :  { %24 = sbr.rel (!%p22_p9) target bundleno = 18 (0x12), region = 110 }
 0x2b4   :  { %684 = vsyncpa [#allocation3], 1 }
 0x2b5   :  { %686 = vsyncpa [#allocation3 + $0x1], 1 }
 0x2b6   :  { %687 = vsyncpa [#allocation11], 1 }
 0x2b7   :  { %688 = vsyncpa [#allocation4], 1 }
 0x2b8   :  { %690 = vsyncpa [#allocation4 + $0x1], 1 }
 0x2b9   :  { %691 = vsyncpa [#allocation5], 1 }
 0x2ba   :  { %693 = vsyncpa [#allocation5 + $0x1], 1 }
 0x2bb   :  { %694 = vsyncpa [#allocation7], 1 }

</bundles_post_ra>
